<compile_context>
chip_gen: v5e
topology: v5e:2x2
jax: 0.10.0
libtpu: 0.0.40
codegen_flags: <defaults>
</compile_context>

<pallas_src>
import functools

import jax
import jax.numpy as jnp
from jax.experimental import pallas as pl
from jax.experimental.pallas import tpu as pltpu

LANES = 128
DEFAULT_BLOCK_BYTES = 2 << 20  # ~2 MiB per input block (per grid step)


def _wmse_kernel(yp_ref, yt_ref, out_ref, *,
                 b_lower, b_upper, tail_weight, middle_weight,
                 n_rows, block_rows, steps_per_core, ragged):
    c = pl.program_id(0)   # TensorCore split index
    j = pl.program_id(1)   # step within this core's row-block range

    @pl.when(j == 0)
    def _():
        out_ref[...] = jnp.zeros_like(out_ref)

    yt = yt_ref[...].astype(jnp.float32)
    yp = yp_ref[...].astype(jnp.float32)

    # weights: tail_weight outside [b_lower, b_upper], middle_weight inside
    w = jnp.where((yt < b_lower) | (yt > b_upper),
                  jnp.float32(tail_weight), jnp.float32(middle_weight))
    d = yp - yt
    wse = w * d * d

    if not ragged:
        # Grid covers the rows exactly: plain accumulate, no mask anywhere.
        out_ref[...] += jnp.sum(wse, axis=0, keepdims=True)
    else:
        # Logical global row-block index (the index_map clamps the physical
        # one, so duplicate trailing blocks re-read real data but are fully
        # masked out here).
        g = c * steps_per_core + j
        boundary = (g + 1) * block_rows > n_rows

        @pl.when(jnp.logical_not(boundary))
        def _():
            out_ref[...] += jnp.sum(wse, axis=0, keepdims=True)

        @pl.when(boundary)
        def _():
            # Only the (<=2) boundary blocks pay for the mask.  jnp.where is a
            # per-element select, so garbage (even NaN) in out-of-range rows
            # cannot propagate.
            row = jax.lax.broadcasted_iota(jnp.int32, wse.shape, 0) + g * block_rows
            masked = jnp.where(row < n_rows, wse, jnp.float32(0.0))
            out_ref[...] += jnp.sum(masked, axis=0, keepdims=True)


def weighted_mse_loss(y_pred, y_true, b_lower, b_upper,
                      tail_weight=4, middle_weight=3,
                      block_bytes=DEFAULT_BLOCK_BYTES,
                      num_core_splits=2):
    """Pallas implementation of WeightedMSELoss.forward. Returns a scalar f32."""
    assert y_pred.shape == y_true.shape
    n_total = int(y_pred.size)

    # Keep native dtypes; the kernel upcasts after the (cheaper) narrow DMA.
    yp = jnp.ravel(y_pred)
    yt = jnp.ravel(y_true)

    # Lane alignment: only when n_total is not a multiple of 128, pad both
    # arrays with equal values (pred == true -> zero weighted error, so the
    # mean over the true n_total stays exact).  At most 127 elements.
    pad = (-n_total) % LANES
    if pad:
        yp = jnp.concatenate([yp, jnp.zeros((pad,), yp.dtype)])
        yt = jnp.concatenate([yt, jnp.zeros((pad,), yt.dtype)])

    n_rows = (n_total + pad) // LANES
    yp2 = yp.reshape(n_rows, LANES)
    yt2 = yt.reshape(n_rows, LANES)

    # Sublane alignment: max packing requirement across BOTH dtypes
    # (mixed-dtype safe, e.g. f32 pred + bf16 targets).
    def _sublanes(dt):
        return {4: 8, 2: 16, 1: 32}.get(jnp.dtype(dt).itemsize, 8)
    sub = max(_sublanes(yp.dtype), _sublanes(yt.dtype))

    isz_p = jnp.dtype(yp.dtype).itemsize
    isz_t = jnp.dtype(yt.dtype).itemsize

    # Fixed byte budget per block: the *wider* input stays at ~block_bytes.
    rows_budget = max(sub, block_bytes // (max(isz_p, isz_t) * LANES))
    rows_budget = (rows_budget // sub) * sub

    if n_rows < sub:
        br = n_rows  # block equals the full array extent (always legal)
    else:
        br = min(rows_budget, (n_rows // sub) * sub)

    nb = pl.cdiv(n_rows, br)  # number of real row blocks

    # Leading "parallel" axis: shard row blocks across TensorCores (2 on v7x).
    c_dim = num_core_splits if nb >= num_core_splits else 1
    s_dim = pl.cdiv(nb, c_dim)          # steps per core
    ragged = (c_dim * s_dim * br) != n_rows

    # Clamp the physical block index so over-covering grids never DMA past the
    # array; the kernel masks those rows via the *logical* index instead.
    def in_map(c, j):
        return (jnp.minimum(c * s_dim + j, nb - 1), 0)

    kernel = functools.partial(
        _wmse_kernel,
        b_lower=float(b_lower), b_upper=float(b_upper),
        tail_weight=float(tail_weight), middle_weight=float(middle_weight),
        n_rows=n_rows, block_rows=br, steps_per_core=s_dim, ragged=ragged,
    )

    partials = pl.pallas_call(
        kernel,
        out_shape=jax.ShapeDtypeStruct((c_dim, LANES), jnp.float32),
        grid_spec=pltpu.PrefetchScalarGridSpec(
            num_scalar_prefetch=0,
            grid=(c_dim, s_dim),
            in_specs=[
                pl.BlockSpec((br, LANES), in_map),
                pl.BlockSpec((br, LANES), in_map),
            ],
            out_specs=pl.BlockSpec((1, LANES), lambda c, j: (c, 0)),
        ),
        compiler_params=pltpu.CompilerParams(
            dimension_semantics=("parallel", "arbitrary")),
        cost_estimate=pl.CostEstimate(
            flops=8 * n_total,
            transcendentals=0,
            bytes_accessed=n_total * (isz_p + isz_t) + c_dim * LANES * 4),
    )(yp2, yt2)

    # Final cross-lane reduce + divide by the TRUE element count (tiny XLA op).
    return jnp.sum(partials) / jnp.float32(n_total)


def _reference(y_pred, y_true, b_lower, b_upper, tail_weight=4, middle_weight=3):
    yt = y_true.astype(jnp.float32)
    w = jnp.where((yt < b_lower) | (yt > b_upper),
                  jnp.float32(tail_weight), jnp.float32(middle_weight))
    return jnp.mean(w * (y_pred.astype(jnp.float32) - yt) ** 2)


if __name__ == "__main__":
    key = jax.random.PRNGKey(0)
    b_lower, b_upper = 0.3, 0.7

    # Test 1: small NCHW f32 inputs (single block, exact coverage).
    k1, k2, key = *jax.random.split(key, 2), key
    k1, k2, k3, k4, k5, k6 = jax.random.split(jax.random.PRNGKey(0), 6)
    B, C, H, W = 2, 4, 16, 16
    y_pred = jax.random.normal(k1, (B, C, H, W), dtype=jnp.float32)
    y_true = jax.random.uniform(k2, (B, C, H, W), dtype=jnp.float32)
    loss = jax.block_until_ready(
        weighted_mse_loss(y_pred, y_true, b_lower, b_upper, 4, 3))
    ref = _reference(y_pred, y_true, b_lower, b_upper, 4, 3)
    assert jnp.allclose(loss, ref, rtol=1e-5, atol=1e-6), (loss, ref)

    # Test 2: odd-sized, non-multiple-of-128, mixed dtype (f32 pred / bf16
    # targets) -> exercises padding, ragged mask, mixed-dtype sublane rule
    # and the 2-way core split.
    y_pred2 = jax.random.normal(k3, (2, 4, 37, 53), dtype=jnp.float32)
    y_true2 = jax.random.uniform(k4, (2, 4, 37, 53), dtype=jnp.bfloat16)
    loss2 = jax.block_until_ready(
        weighted_mse_loss(y_pred2, y_true2, b_lower, b_upper, 4, 3))
    ref2 = _reference(y_pred2, y_true2, b_lower, b_upper, 4, 3)
    assert jnp.allclose(loss2, ref2, rtol=1e-5, atol=1e-6), (loss2, ref2)

    # Test 3: tiny block override -> odd block count, so the core split
    # over-covers by one clamped + fully-masked block.
    y_pred3 = jax.random.normal(k5, (1, 1, 17, 128), dtype=jnp.float32)
    y_true3 = jax.random.uniform(k6, (1, 1, 17, 128), dtype=jnp.float32)
    loss3 = jax.block_until_ready(
        weighted_mse_loss(y_pred3, y_true3, b_lower, b_upper, 4, 3,
                          block_bytes=8 * LANES * 4))
    ref3 = _reference(y_pred3, y_true3, b_lower, b_upper, 4, 3)
    assert jnp.allclose(loss3, ref3, rtol=1e-5, atol=1e-6), (loss3, ref3)

    print("KERNEL_OK")
</pallas_src>

<mosaic_0001>
module attributes {stable_mosaic.version = 11 : i64} {
  func.func @_wmse_kernel(%arg0: i32, %arg1: i32, %arg2: memref<16x128xf32, #tpu.memory_space<vmem>>, %arg3: memref<16x128xf32, #tpu.memory_space<vmem>>, %arg4: memref<1x128xf32, #tpu.memory_space<vmem>>) attributes {dimension_semantics = [#tpu.dimension_semantics<parallel>, #tpu.dimension_semantics<arbitrary>], iteration_bounds = array<i64: 1, 1>, scalar_prefetch = 0 : i64, scratch_operands = 0 : i64, tpu.core_type = #tpu.core_type<tc>, window_params = [{transform_indices = @transform_0, window_bounds = array<i64: 16, 128>}, {transform_indices = @transform_1, window_bounds = array<i64: 16, 128>}, {transform_indices = @transform_2, window_bounds = array<i64: 1, 128>}]} {
    %c0_i32 = arith.constant 0 : i32
    %0 = arith.cmpi eq, %arg1, %c0_i32 : i32
    %1 = arith.extui %0 : i1 to i32
    %c0_i32_0 = arith.constant 0 : i32
    %2 = arith.cmpi ne, %1, %c0_i32_0 : i32
    scf.if %2 {
      %cst_12 = arith.constant 0.000000e+00 : f32
      %21 = vector.broadcast %cst_12 : f32 to vector<1x128xf32>
      %c0_13 = arith.constant 0 : index
      %c0_14 = arith.constant 0 : index
      %22 = vector.load %arg4[%c0_13, %c0_14] : memref<1x128xf32, #tpu.memory_space<vmem>>, vector<1x128xf32>
      tpu.vector_store %arg4[%c0_13, %c0_14], %21 {strides = array<i32>} : memref<1x128xf32, #tpu.memory_space<vmem>>, vector<1x128xf32>,
    } else {
    }
    %c0 = arith.constant 0 : index
    %c0_1 = arith.constant 0 : index
    %3 = vector.load %arg3[%c0, %c0_1] : memref<16x128xf32, #tpu.memory_space<vmem>>, vector<16x128xf32>
    %c0_2 = arith.constant 0 : index
    %c0_3 = arith.constant 0 : index
    %4 = vector.load %arg2[%c0_2, %c0_3] : memref<16x128xf32, #tpu.memory_space<vmem>>, vector<16x128xf32>
    %cst = arith.constant 3.000000e-01 : f32
    %5 = vector.broadcast %cst : f32 to vector<16x128xf32>
    %6 = arith.cmpf olt, %3, %5 : vector<16x128xf32>
    %cst_4 = arith.constant 0.699999988 : f32
    %7 = vector.broadcast %cst_4 : f32 to vector<16x128xf32>
    %8 = arith.cmpf ogt, %3, %7 : vector<16x128xf32>
    %9 = arith.ori %6, %8 : vector<16x128xi1>
    %cst_5 = arith.constant 4.000000e+00 : f32
    %cst_6 = arith.constant 3.000000e+00 : f32
    %10 = vector.broadcast %cst_5 : f32 to vector<16x128xf32>
    %11 = vector.broadcast %cst_6 : f32 to vector<16x128xf32>
    %12 = arith.select %9, %10, %11 : vector<16x128xi1>, vector<16x128xf32>
    %13 = arith.subf %4, %3 : vector<16x128xf32>
    %14 = arith.mulf %12, %13 : vector<16x128xf32>
    %15 = arith.mulf %14, %13 : vector<16x128xf32>
    %c0_7 = arith.constant 0 : index
    %c0_8 = arith.constant 0 : index
    %16 = vector.load %arg4[%c0_7, %c0_8] : memref<1x128xf32, #tpu.memory_space<vmem>>, vector<1x128xf32>
    %cst_9 = arith.constant dense<0.000000e+00> : vector<128xf32>
    %17 = vector.multi_reduction <add>, %15, %cst_9 [0] : vector<16x128xf32> to vector<128xf32>
    %18 = vector.shape_cast %17 : vector<128xf32> to vector<1x128xf32>
    %19 = arith.addf %16, %18 : vector<1x128xf32>
    %c0_10 = arith.constant 0 : index
    %c0_11 = arith.constant 0 : index
    %20 = vector.load %arg4[%c0_10, %c0_11] : memref<1x128xf32, #tpu.memory_space<vmem>>, vector<1x128xf32>
    tpu.vector_store %arg4[%c0_10, %c0_11], %19 {strides = array<i32>} : memref<1x128xf32, #tpu.memory_space<vmem>>, vector<1x128xf32>,
    return
  }
  func.func @transform_0(%arg0: i32, %arg1: i32) -> (i32, i32) {
    %c1_i32 = arith.constant 1 : i32
    %0 = arith.muli %arg0, %c1_i32 : i32
    %1 = arith.addi %0, %arg1 : i32
    %c0_i32 = arith.constant 0 : i32
    %2 = arith.minsi %1, %c0_i32 : i32
    %c0_i32_0 = arith.constant 0 : i32
    %c0_i32_1 = arith.constant 0 : i32
    return %2, %c0_i32_0 : i32, i32
  }
  func.func @transform_1(%arg0: i32, %arg1: i32) -> (i32, i32) {
    %c1_i32 = arith.constant 1 : i32
    %0 = arith.muli %arg0, %c1_i32 : i32
    %1 = arith.addi %0, %arg1 : i32
    %c0_i32 = arith.constant 0 : i32
    %2 = arith.minsi %1, %c0_i32 : i32
    %c0_i32_0 = arith.constant 0 : i32
    %c0_i32_1 = arith.constant 0 : i32
    return %2, %c0_i32_0 : i32, i32
  }
  func.func @transform_2(%arg0: i32, %arg1: i32) -> (i32, i32) {
    %c0_i32 = arith.constant 0 : i32
    %c0_i32_0 = arith.constant 0 : i32
    return %arg0, %c0_i32 : i32, i32
  }
}

</mosaic_0001>

<bundles_post_ra>
// kernel: tpu_custom_call.1
= control target key start
LH: loop header
LB: loop body
LE: loop exit
PB: predicated region body
PF: predicated region fallthrough
CT: control target
= control target key end

     0   :  { %7 = vsyncpa [#allocation3], 0  ;;  %s235_s0 = inlined_call_operand.hbm [shape: f32[16,128], index: 0, kind: input, shape index: {}]   ;;  %s236_s1 = inlined_call_operand.hbm [shape: f32[16,128], index: 1, kind: input, shape index: {}]   ;;  %s237_s2 = inlined_call_operand.hbm [shape: f32[1,128], index: 2, kind: output, shape index: {}]  }
   0x1   :  { %8 = vsyncpa [#allocation6], 0 }
   0x2   :  { %9 = vsyncpa [#allocation4], 0  ;;  %s20_s11 = sshll.u32 %s235_s0, 4  ;;  %s204_s12 = smov [#allocation2]   ;;  %s21_s11 = int_to_ptr.hbm [resolvable:$true] %s20_s11 }
   0x3   :  { %s22_s13 = sshll.u32 %s204_s12, 4  ;;  %s39_s16 = sshll.u32 %s236_s1, 4  ;;  %s23_s13 = int_to_ptr.vmem [resolvable:$true] %s22_s13  ;;  %s40_s16 = int_to_ptr.hbm [resolvable:$true] %s39_s16 }
   0x4   :  { %s205_s17 = smov 128   ;;  %s206_s18 = smov 8  }
   0x5   :  { %28 = dma.hbm_to_vmem [thread:$0]  %s21_s11, 256, %s23_s13, [#allocation3], %s205_s17, %s205_s17, %s206_s18  }
   0x6   :  { %s207_s19 = smov [#allocation5]  }
   0x7   :  { %s41_s20 = sshll.u32 %s207_s19, 4  ;;  %s42_s20 = int_to_ptr.vmem [resolvable:$true] %s41_s20 }
   0x8   :  { %47 = dma.hbm_to_vmem [thread:$0]  %s40_s16, 256, %s42_s20, [#allocation6], %s205_s17, %s205_s17, %s206_s18  }
   0x9   :  { %198 = dma.done.wait [#allocation3], 256  }
   0xa   :  { %199 = vsyncadd [#allocation3], 4294967040 }
   0xb   :  { %200 = dma.done.wait [#allocation6], 256  }
   0xc   :  { %201 = vsyncadd [#allocation6], 4294967040  ;;  %v208_v0 = vmov 0.0   ;;  %v69_v1 = vld [vmem:[#allocation5] sm:$0xff]  ;;  %v70_v2 = vld [vmem:[#allocation5 + $0x8] sm:$0xff]  ;;  %v209_v7 = vmov 3.0  }
   0xd   :  { %68 = vst [vmem:[#allocation7] sm:$0x1] %v208_v0  ;;  %v71_v3 = vld [vmem:[#allocation2] sm:$0xff]  ;;  %v72_v4 = vld [vmem:[#allocation2 + $0x8] sm:$0xff]  ;;  %vm73_vm0 = vcmp.lt.f32.partialorder %v69_v1, 0.3 }
   0xe   :  { %vm74_vm1 = vcmp.lt.f32.partialorder %v70_v2, 0.3  ;;  %v81_v5 = vsub.f32 %v71_v3, %v69_v1  ;;  %vm75_vm2 = vcmp.gt.f32.partialorder %v69_v1, 0.7  ;;  %vm76_vm3 = vcmp.gt.f32.partialorder %v70_v2, 0.7 }
   0xf   :  { %v82_v6 = vsub.f32 %v72_v4, %v70_v2  ;;  %vm77_vm4 = vmor %vm73_vm0, %vm75_vm2  ;;  %s210_s0 = smov [#allocation7]   ;;  %s104_s23 = sshll.u32 %s237_s2, 4  ;;  %s105_s23 = int_to_ptr.hbm [resolvable:$true] %s104_s23 }
  0x10   :  { %vm78_vm5 = vmor %vm74_vm1, %vm76_vm3  ;;  %v79_v8 = vsel %vm77_vm4, 4.0, %v209_v7  ;;  %s102_s1 = sshll.u32 %s210_s0, 4  ;;  %s103_s1 = int_to_ptr.vmem [resolvable:$true] %s102_s1 }
  0x11   :  { %v80_v9 = vsel %vm78_vm5, 4.0, %v209_v7  ;;  %v83_v10 = vmul.f32 %v81_v5, %v79_v8 }
  0x12   :  { %v84_v11 = vmul.f32 %v82_v6, %v80_v9 }
  0x13   :  { %v85_v12 = vmul.f32 %v83_v10, %v81_v5 }
  0x14   :  { %v86_v13 = vmul.f32 %v84_v11, %v82_v6  ;;  %v87_v20 = vld [vmem:[#allocation7] sm:$0x1] }
  0x16   :  { %v88_v14 = vadd.f32 %v86_v13, %v85_v12 }
  0x18   :  { %v89_v15 = vrot.slane %v88_v14, 4 }
  0x1a   :  { %v90_v16 = vadd.f32 %v89_v15, %v88_v14 }
  0x1c   :  { %v91_v17 = vrot.slane %v90_v16, 2 }
  0x1e   :  { %v92_v18 = vadd.f32 %v91_v17, %v90_v16 }
  0x20   :  { %v93_v19 = vrot.slane %v92_v18, 1 }
  0x22   :  { %v94_v21 = vadd.f32 %v93_v19, %v92_v18 }
  0x24   :  { %v95_v22 = vadd.f32 %v94_v21, %v87_v20 }
  0x26   :  { %96 = vst [vmem:[#allocation7] sm:$0x1] %v95_v22 }
  0x27   :  { %107 = dma.vmem_to_hbm [thread:$0]  %s103_s1, 16, %s105_s23, [#allocation4]  }
  0x28   :  { %202 = dma.done.wait [#allocation4], 16  }
  0x29   :  { %203 = vsyncadd [#allocation4], 4294967280 }
  0x2a   :  { %112 = vsyncpa [#allocation3], 1 }
  0x2b   :  { %113 = vsyncpa [#allocation6], 1 }
  0x2c   :  { %114 = vsyncpa [#allocation4], 1 }

</bundles_post_ra>
